<compile_context>
chip_gen: v7x
topology: tpu7x:2x2x1
jax: 0.10.0
libtpu: 0.0.40
codegen_flags: <defaults>
</compile_context>

<pallas_src>
import functools

import jax
import jax.numpy as jnp
from jax.experimental import pallas as pl
from jax.experimental.pallas import tpu as pltpu


def _fused_downconv_kernel(xt_ref, wm_ref, p_ref, a_ref, o_ref, *, eps,
                           n_batch):
    """Single-program fused Conv3d(2,2) + PReLU + BatchNorm3d (training stats).

    xt_ref : (K, N*S)  im2col patch matrix, rows (c,kd,kh,kw), cols (n,do,ho,wo)
    wm_ref : (Cout, K) conv weights
    p_ref  : (Cout, 3) packed [bias | gamma | beta]
    a_ref  : (1, 1)    PReLU slope (SMEM scalar)
    o_ref  : (N, Cout, S) output, NCDHW-flattened
    """
    # Conv3d(kernel=2, stride=2) == one matmul against the patch matrix; the
    # batch dim is merged into the lane axis (N*S lane-dense columns).
    y = jnp.dot(wm_ref[...], xt_ref[...],
                preferred_element_type=jnp.float32)           # (Cout, N*S)
    y = y + p_ref[:, 0:1]                                     # conv bias
    alpha = a_ref[0, 0]                                       # PReLU (1 slope)
    y = jnp.where(y >= 0.0, y, alpha * y)

    # BatchNorm3d training statistics: reduce over (N, D, H, W) == the lane
    # axis here.  Exact two-pass mean / biased variance, all in f32.
    inv_m = 1.0 / float(y.shape[1])
    mean = jnp.sum(y, axis=1, keepdims=True) * inv_m          # (Cout, 1)
    cen = y - mean
    var = jnp.sum(cen * cen, axis=1, keepdims=True) * inv_m   # (Cout, 1)
    scale = p_ref[:, 1:2] * jax.lax.rsqrt(var + eps)          # gamma / std
    ybn = cen * scale + p_ref[:, 2:3]                         # + beta

    # Per-batch lane slabs (static, multiples of 128 lanes) -> output already
    # in (N, Cout, Do*Ho*Wo) order; the wrapper reshape to NCDHW is free.
    s = ybn.shape[1] // n_batch
    for n in range(n_batch):                                  # static unroll
        o_ref[n] = ybn[:, n * s:(n + 1) * s]


def down_conv(x, w, b, alpha, gamma, beta, eps=1e-5):
    """x: (N, C_in, D, H, W) f32 -> (N, C_out, D//2, H//2, W//2) f32."""
    N, C, D, H, W = x.shape
    Cout = w.shape[0]
    assert D % 2 == 0 and H % 2 == 0 and W % 2 == 0
    Do, Ho, Wo = D // 2, H // 2, W // 2
    S = Do * Ho * Wo
    K = C * 8

    # im2col of the non-overlapping 2x2x2 patches -> (K, N*S) patch matrix,
    # rows ordered (c, kd, kh, kw) to match w.reshape(Cout, K), columns
    # ordered (n, do, ho, wo) so the kernel's output slabs land in NCDHW order.
    # TODO(synk): this transpose is the one remaining non-kernel HBM pass;
    # remove it with a channels-last activation layout upstream or an
    # in-kernel per-tap strided-read decomposition.
    xt = x.astype(jnp.float32).reshape(N, C, Do, 2, Ho, 2, Wo, 2)
    xt = xt.transpose(1, 3, 5, 7, 0, 2, 4, 6).reshape(K, N * S)

    wm = w.reshape(Cout, K).astype(jnp.float32)                    # (Cout, K)
    params = jnp.stack(
        [b.astype(jnp.float32),
         gamma.astype(jnp.float32),
         beta.astype(jnp.float32)], axis=1)                        # (Cout, 3)
    am = jnp.reshape(alpha, (1, 1)).astype(jnp.float32)            # SMEM scalar

    kernel = functools.partial(_fused_downconv_kernel, eps=float(eps),
                               n_batch=N)

    out = pl.pallas_call(
        kernel,
        out_shape=jax.ShapeDtypeStruct((N, Cout, S), jnp.float32),
        in_specs=[
            pl.BlockSpec(memory_space=pltpu.MemorySpace.VMEM),   # patch matrix
            pl.BlockSpec(memory_space=pltpu.MemorySpace.VMEM),   # conv weights
            pl.BlockSpec(memory_space=pltpu.MemorySpace.VMEM),   # bias|gamma|beta
            pl.BlockSpec(memory_space=pltpu.MemorySpace.SMEM),   # PReLU slope
        ],
        out_specs=pl.BlockSpec(memory_space=pltpu.MemorySpace.VMEM),
        compiler_params=pltpu.CompilerParams(
            vmem_limit_bytes=32 * 1024 * 1024),
    )(xt, wm, params, am)

    # (N, Cout, S) is already NCDHW order -> free reshape.
    return out.reshape(N, Cout, Do, Ho, Wo)


def reference(x, w, b, alpha, gamma, beta, eps=1e-5):
    Cout = w.shape[0]
    y = jax.lax.conv_general_dilated(
        x, w, window_strides=(2, 2, 2), padding="VALID",
        dimension_numbers=("NCDHW", "OIDHW", "NCDHW"))
    y = y + b.reshape(1, Cout, 1, 1, 1)
    y = jnp.where(y >= 0.0, y, alpha * y)                     # PReLU (1 slope)
    mean = y.mean(axis=(0, 2, 3, 4), keepdims=True)
    var = y.var(axis=(0, 2, 3, 4), keepdims=True)             # biased (BN train)
    y = (y - mean) * jax.lax.rsqrt(var + eps)
    return y * gamma.reshape(1, Cout, 1, 1, 1) + beta.reshape(1, Cout, 1, 1, 1)


if __name__ == "__main__":
    key = jax.random.PRNGKey(0)
    in_ch, out_ch = 4, 8
    N, D, H, W = 2, 16, 16, 16

    kx, kw, kb = jax.random.split(key, 3)
    x = jax.random.normal(kx, (N, in_ch, D, H, W), dtype=jnp.float32)
    # Synthetic parameters matching nn.Conv3d(in_ch, out_ch, 2, 2) + PReLU + BN.
    w = 0.1 * jax.random.normal(kw, (out_ch, in_ch, 2, 2, 2), dtype=jnp.float32)
    b = 0.05 * jax.random.normal(kb, (out_ch,), dtype=jnp.float32)
    alpha = jnp.float32(0.25)                        # PReLU default init
    gamma = jnp.ones((out_ch,), dtype=jnp.float32)   # BatchNorm3d weight init
    beta = jnp.zeros((out_ch,), dtype=jnp.float32)   # BatchNorm3d bias init

    out = down_conv(x, w, b, alpha, gamma, beta)
    out = jax.block_until_ready(out)

    ref = reference(x, w, b, alpha, gamma, beta)
    assert out.shape == (N, out_ch, D // 2, H // 2, W // 2)
    assert jnp.allclose(out, ref, rtol=2e-3, atol=2e-3)

    print("KERNEL_OK")
</pallas_src>

<mosaic_0001>
module attributes {stable_mosaic.version = 11 : i64} {
  func.func @_fused_downconv_kernel(%arg0: memref<32x1024xf32, #tpu.memory_space<vmem>>, %arg1: memref<8x32xf32, #tpu.memory_space<vmem>>, %arg2: memref<8x3xf32, #tpu.memory_space<vmem>>, %arg3: memref<1x1xf32, #tpu.memory_space<smem>>, %arg4: memref<2x8x512xf32, #tpu.memory_space<vmem>>) attributes {dimension_semantics = [], scalar_prefetch = 0 : i64, scratch_operands = 0 : i64, tpu.core_type = #tpu.core_type<tc>} {
    %c0 = arith.constant 0 : index
    %c0_0 = arith.constant 0 : index
    %0 = vector.load %arg1[%c0, %c0_0] : memref<8x32xf32, #tpu.memory_space<vmem>>, vector<8x32xf32>
    %c0_1 = arith.constant 0 : index
    %c0_2 = arith.constant 0 : index
    %1 = vector.load %arg0[%c0_1, %c0_2] : memref<32x1024xf32, #tpu.memory_space<vmem>>, vector<32x1024xf32>
    %cst = arith.constant dense<0.000000e+00> : vector<8x1024xf32>
    %2 = tpu.matmul %0, %1, %cst {dimension_numbers = #tpu.dot_dimension_numbers<[1], [0], [0], [1], [0, 0, 1, 1], [], []>} : vector<8x32xf32>, vector<32x1024xf32>, vector<8x1024xf32> -> vector<8x1024xf32>
    %c0_3 = arith.constant 0 : index
    %c0_4 = arith.constant 0 : index
    %3 = vector.load %arg2[%c0_3, %c0_4] : memref<8x3xf32, #tpu.memory_space<vmem>>, vector<8x1xf32>
    %4 = vector.broadcast %3 : vector<8x1xf32> to vector<8x1024xf32>
    %5 = arith.addf %2, %4 : vector<8x1024xf32>
    %c0_5 = arith.constant 0 : index
    %c0_6 = arith.constant 0 : index
    %6 = memref.load %arg3[%c0_5, %c0_6] : memref<1x1xf32, #tpu.memory_space<smem>>
    %cst_7 = arith.constant 0.000000e+00 : f32
    %7 = vector.broadcast %cst_7 : f32 to vector<8x1024xf32>
    %8 = arith.cmpf oge, %5, %7 : vector<8x1024xf32>
    %9 = vector.broadcast %6 : f32 to vector<8x1024xf32>
    %10 = arith.mulf %9, %5 : vector<8x1024xf32>
    %11 = arith.select %8, %5, %10 : vector<8x1024xi1>, vector<8x1024xf32>
    %cst_8 = arith.constant dense<0.000000e+00> : vector<8xf32>
    %12 = vector.multi_reduction <add>, %11, %cst_8 [1] : vector<8x1024xf32> to vector<8xf32>
    %13 = vector.shape_cast %12 : vector<8xf32> to vector<8x1xf32>
    %cst_9 = arith.constant 9.765625E-4 : f32
    %14 = vector.broadcast %cst_9 : f32 to vector<8x1xf32>
    %15 = arith.mulf %13, %14 : vector<8x1xf32>
    %16 = vector.broadcast %15 : vector<8x1xf32> to vector<8x1024xf32>
    %17 = arith.subf %11, %16 : vector<8x1024xf32>
    %18 = arith.mulf %17, %17 : vector<8x1024xf32>
    %cst_10 = arith.constant dense<0.000000e+00> : vector<8xf32>
    %19 = vector.multi_reduction <add>, %18, %cst_10 [1] : vector<8x1024xf32> to vector<8xf32>
    %20 = vector.shape_cast %19 : vector<8xf32> to vector<8x1xf32>
    %cst_11 = arith.constant 9.765625E-4 : f32
    %21 = vector.broadcast %cst_11 : f32 to vector<8x1xf32>
    %22 = arith.mulf %20, %21 : vector<8x1xf32>
    %c0_12 = arith.constant 0 : index
    %c1 = arith.constant 1 : index
    %23 = vector.load %arg2[%c0_12, %c1] : memref<8x3xf32, #tpu.memory_space<vmem>>, vector<8x1xf32>
    %cst_13 = arith.constant 9.99999974E-6 : f32
    %24 = vector.broadcast %cst_13 : f32 to vector<8x1xf32>
    %25 = arith.addf %22, %24 : vector<8x1xf32>
    %26 = math.rsqrt %25 : vector<8x1xf32>
    %27 = arith.mulf %23, %26 : vector<8x1xf32>
    %28 = vector.broadcast %27 : vector<8x1xf32> to vector<8x1024xf32>
    %29 = arith.mulf %17, %28 : vector<8x1024xf32>
    %c0_14 = arith.constant 0 : index
    %c2 = arith.constant 2 : index
    %30 = vector.load %arg2[%c0_14, %c2] : memref<8x3xf32, #tpu.memory_space<vmem>>, vector<8x1xf32>
    %31 = vector.broadcast %30 : vector<8x1xf32> to vector<8x1024xf32>
    %32 = arith.addf %29, %31 : vector<8x1024xf32>
    %33 = vector.extract_strided_slice %32 {offsets = [0, 0], sizes = [8, 512], strides = [1, 1]} : vector<8x1024xf32> to vector<8x512xf32>
    %c0_15 = arith.constant 0 : index
    %c0_16 = arith.constant 0 : index
    %c0_17 = arith.constant 0 : index
    %34 = vector.load %arg4[%c0_15, %c0_16, %c0_17] : memref<2x8x512xf32, #tpu.memory_space<vmem>>, vector<1x8x512xf32>
    %35 = vector.shape_cast %34 : vector<1x8x512xf32> to vector<8x512xf32>
    %36 = vector.shape_cast %33 : vector<8x512xf32> to vector<1x8x512xf32>
    tpu.vector_store %arg4[%c0_15, %c0_16, %c0_17], %36 {strides = array<i32>} : memref<2x8x512xf32, #tpu.memory_space<vmem>>, vector<1x8x512xf32>,
    %37 = vector.extract_strided_slice %32 {offsets = [0, 512], sizes = [8, 512], strides = [1, 1]} : vector<8x1024xf32> to vector<8x512xf32>
    %c1_18 = arith.constant 1 : index
    %c0_19 = arith.constant 0 : index
    %c0_20 = arith.constant 0 : index
    %38 = vector.load %arg4[%c1_18, %c0_19, %c0_20] : memref<2x8x512xf32, #tpu.memory_space<vmem>>, vector<1x8x512xf32>
    %39 = vector.shape_cast %38 : vector<1x8x512xf32> to vector<8x512xf32>
    %40 = vector.shape_cast %37 : vector<8x512xf32> to vector<1x8x512xf32>
    tpu.vector_store %arg4[%c1_18, %c0_19, %c0_20], %40 {strides = array<i32>} : memref<2x8x512xf32, #tpu.memory_space<vmem>>, vector<1x8x512xf32>,
    return
  }
}

</mosaic_0001>

<bundles_post_ra>
// kernel: tpu_custom_call.1
= control target key start
LH: loop header
LB: loop body
LE: loop exit
PB: predicated region body
PF: predicated region fallthrough
CT: control target
= control target key end

     0   :  { %10 = vsyncpa [#allocation4], 0  ;;  %s664_s0 = inlined_call_operand.hbm [shape: f32[32,1024], index: 0, kind: input, shape index: {}]   ;;  %s665_s1 = inlined_call_operand.vmem [shape: f32[8,32], index: 1, kind: input, shape index: {}]   ;;  %s666_s2 = inlined_call_operand.vmem [shape: f32[8,3], index: 2, kind: input, shape index: {}]   ;;  %s667_s3 = inlined_call_operand.<no memory space> [shape: f32[1,1], index: 3, kind: input, shape index: {}]   ;;  %s668_s4 = inlined_call_operand.hbm [shape: f32[2,8,512], index: 4, kind: output, shape index: {}]  }
   0x1   :  { %11 = vsyncpa [#allocation5], 0  ;;  %s576_s15 = smov [#allocation3]   ;;  %s528_s19 = scalar_lea.hbm %s664_s0, 4096 }
   0x2   :  { %s17_s16 = sshll.u32 %s576_s15, 4  ;;  %p529_p0 = scmp.ne.s32.totalorder %s664_s0, %s528_s19  ;;  %s18_s16 = int_to_ptr.vmem [resolvable:$true] %s17_s16 }
   0x3   :  { %p532_p1 = scmp.lt.u32.totalorder %s528_s19, %s664_s0 }
   0x5   :  { %p534_p2 = pnand %p532_p1, %p529_p0 }
   0x7   :  { %537 = shalt.err (!%p534_p2)
}
   0x8   :  { %s538_s24 = scalar_lea.vmem %s18_s16, 4096  ;;  %p543_p4 = scmp.lt.s32.totalorder %s18_s16, %s18_s16 }
   0x9   :  { %p539_p3 = scmp.ne.s32.totalorder %s18_s16, %s538_s24  ;;  %p544_p5 = scmp.lt.s32.totalorder %s538_s24, %s538_s24 }
   0xb   :  { %p545_p6 = por %p544_p5, %p543_p4 }
   0xd   :  { %p546_p7 = pnand %p545_p6, %p539_p3 }
   0xf   :  { %549 = shalt.err (!%p546_p7)
}
  0x10   :  { %s577_s25 = smov 1024   ;;  %s578_s26 = smov 64  }
  0x11   :  { %23 = dma.hbm_to_vmem [thread:$0]  %s664_s0, 4096, %s18_s16, [#allocation4], %s577_s25, %s577_s25, %s578_s26  }
  0x12   :  { %572 = dma.done.wait [#allocation4], 4096  }
  0x13   :  { %573 = vsyncadd [#allocation4], 4294963200  ;;  %v579_v0 = vmov 0.0   ;;  %v580_v1 = vmov 0   ;;  %v35_v2 = vld [vmem:[#allocation3 + $0x8] sm:$0xff]  ;;  %v37_v4 = vld [vmem:[#allocation3 + $0x18] sm:$0xff]  ;;  %v369_v54 = vstv %s667_s3 }
  0x14   :  { %140 = vmatprep.mubr.f32.mxu0 %v579_v0  ;;  %211 = vmatprep.mubr.f32.mxu1 %v579_v0  ;;  %v43_v3 = vld [vmem:[#allocation3 + $0x48] sm:$0xff]  ;;  %v45_v6 = vld [vmem:[#allocation3 + $0x58] sm:$0xff]  ;;  %v34_v7 = vld [vmem:[#allocation3] sm:$0xff]  ;;  %vm72_vm0 = vcmask 261120   ;;  %s583_s3 = smov [#allocation6]  }
  0x15   :  { %522 = vset.pattern.permute.xlu0 %v580_v1  ;;  %v480_v5 = vpack.c.bf16 %v43_v3, %v35_v2  ;;  %v42_v8 = vld [vmem:[#allocation3 + $0x40] sm:$0xff]  ;;  %v488_v9 = vpack.c.bf16 %v45_v6, %v37_v4  ;;  %v36_v11 = vld [vmem:[#allocation3 + $0x10] sm:$0xff]  ;;  %v51_v13 = vld [vmem:[#allocation3 + $0x88] sm:$0xff]  ;;  %s464_s6 = sshll.u32 %s583_s3, 4  ;;  %s645_s6 = int_to_ptr.vmem [resolvable:$true] %s464_s6 }
  0x16   :  { %v482_v10 = vpack.c.bf16 %v42_v8, %v34_v7  ;;  %v44_v12 = vld [vmem:[#allocation3 + $0x50] sm:$0xff]  ;;  %v59_v15 = vld [vmem:[#allocation3 + $0xc8] sm:$0xff]  ;;  %v53_v16 = vld [vmem:[#allocation3 + $0x98] sm:$0xff]  ;;  %s550_s7 = scalar_lea.vmem %s645_s6, 1024  ;;  %p555_p9 = scmp.lt.s32.totalorder %s645_s6, %s645_s6 }
  0x17   :  { %481 = vmatprep.subr.bf16.mxu0 %v480_v5  ;;  %v490_v14 = vpack.c.bf16 %v44_v12, %v36_v11  ;;  %v61_v17 = vld [vmem:[#allocation3 + $0xd8] sm:$0xff]  ;;  %489 = vmatprep.subr.bf16.mxu1 %v488_v9  ;;  %v484_v18 = vpack.c.bf16 %v59_v15, %v51_v13  ;;  %v50_v20 = vld [vmem:[#allocation3 + $0x80] sm:$0xff]  ;;  %v52_v22 = vld [vmem:[#allocation3 + $0x90] sm:$0xff]  ;;  %p551_p8 = scmp.ne.s32.totalorder %s645_s6, %s550_s7  ;;  %p556_p10 = scmp.lt.s32.totalorder %s550_s7, %s550_s7 }
  0x18   :  { %483 = vmatpush1.bf16.msra.mxu0 %v482_v10  ;;  %v492_v19 = vpack.c.bf16 %v61_v17, %v53_v16  ;;  %v58_v21 = vld [vmem:[#allocation3 + $0xc0] sm:$0xff]  ;;  %v60_v24 = vld [vmem:[#allocation3 + $0xd0] sm:$0xff]  ;;  %v39_v25 = vld [vmem:[#allocation3 + $0x28] sm:$0xff] }
  0x19   :  { %491 = vmatpush1.bf16.msra.mxu1 %v490_v14  ;;  %v486_v23 = vpack.c.bf16 %v58_v21, %v50_v20  ;;  %485 = vmatprep.subr.bf16.mxu0 %v484_v18  ;;  %v494_v26 = vpack.c.bf16 %v60_v24, %v52_v22  ;;  %v33_v27 = vld [vmem:[%s665_s1] sm:$0xff]  ;;  %v47_v28 = vld [vmem:[#allocation3 + $0x68] sm:$0xff]  ;;  %v41_v29 = vld [vmem:[#allocation3 + $0x38] sm:$0xff]  ;;  %p557_p11 = por %p556_p10, %p555_p9 }
  0x1a   :  { %493 = vmatprep.subr.bf16.mxu1 %v492_v19  ;;  %v49_v30 = vld [vmem:[#allocation3 + $0x78] sm:$0xff]  ;;  %v496_v31 = vpack.c.bf16 %v47_v28, %v39_v25  ;;  %v38_v33 = vld [vmem:[#allocation3 + $0x20] sm:$0xff]  ;;  %v40_v35 = vld [vmem:[#allocation3 + $0x30] sm:$0xff] }
  0x1b   :  { %v504_v32 = vpack.c.bf16 %v49_v30, %v41_v29  ;;  %v46_v34 = vld [vmem:[#allocation3 + $0x60] sm:$0xff]  ;;  %v48_v37 = vld [vmem:[#allocation3 + $0x70] sm:$0xff]  ;;  %v55_v38 = vld [vmem:[#allocation3 + $0xa8] sm:$0xff]  ;;  %p558_p12 = pnand %p557_p11, %p551_p8 }
  0x1c   :  { %487 = vmatpush1.bf16.msra.mxu0 %v486_v23  ;;  %v498_v36 = vpack.c.bf16 %v46_v34, %v38_v33  ;;  %v63_v39 = vld [vmem:[#allocation3 + $0xe8] sm:$0xff]  ;;  %v506_v40 = vpack.c.bf16 %v48_v37, %v40_v35  ;;  %v57_v42 = vld [vmem:[#allocation3 + $0xb8] sm:$0xff]  ;;  %v54_v44 = vld [vmem:[#allocation3 + $0xa0] sm:$0xff] }
  0x1d   :  { %495 = vmatpush1.bf16.msra.mxu1 %v494_v26  ;;  %497 = vmatprep.subr.bf16.mxu0 %v496_v31  ;;  %v500_v41 = vpack.c.bf16 %v63_v39, %v55_v38  ;;  %v65_v43 = vld [vmem:[#allocation3 + $0xf8] sm:$0xff]  ;;  %v62_v46 = vld [vmem:[#allocation3 + $0xe0] sm:$0xff]  ;;  %v56_v47 = vld [vmem:[#allocation3 + $0xb0] sm:$0xff] }
  0x1e   :  { %505 = vmatprep.subr.bf16.mxu1 %v504_v32  ;;  %v508_v45 = vpack.c.bf16 %v65_v43, %v57_v42  ;;  %v64_v48 = vld [vmem:[#allocation3 + $0xf0] sm:$0xff]  ;;  %v502_v49 = vpack.c.bf16 %v62_v46, %v54_v44  ;;  %v633_v50 = vld [vmem:[%s666_s2] sm:$0xff] }
  0x1f   :  { %476 = vmatmul.mubr.msk.f32.vlgmr.msra.gmra.mrb[0].mxu0 %vm72_vm0, %v33_v27  ;;  %v510_v51 = vpack.c.bf16 %v64_v48, %v56_v47  ;;  %69 = vperm.xlu0 %522, %v633_v50  }
  0x20   :  { %477 = vmatmul.mubr.msk.f32.vlgmr.msra.gmra.mrb[0].mxu1 %vm72_vm0, %v33_v27  ;;  %499 = vmatpush1.bf16.msra.mxu0 %v498_v36 }
  0x21   :  { %507 = vmatpush1.bf16.msra.mxu1 %v506_v40  ;;  %501 = vmatprep.subr.bf16.mxu0 %v500_v41 }
  0x22   :  { %509 = vmatprep.subr.bf16.mxu1 %v508_v45  ;;  %282 = vmatprep.mubr.f32.mxu0 %v579_v0 }
  0x23   :  { %353 = vmatprep.mubr.f32.mxu1 %v579_v0 }
  0x24   :  { %503 = vmatpush1.bf16.msra.mxu0 %v502_v49 }
  0x25   :  { %511 = vmatpush1.bf16.msra.mxu1 %v510_v51 }
  0x27   :  { %478 = vmatmul.mubr.msk.f32.vlgmr.msra.gmra.mrb[2].mxu0 %vm72_vm0, %v33_v27 }
  0x28   :  { %479 = vmatmul.mubr.msk.f32.vlgmr.msra.gmra.mrb[2].mxu1 %vm72_vm0, %v33_v27 }
  0x9e   :  { %v70_v52 = vpop.permute.xlu0 %69 }
  0xf2   :  { %v142_v53 = vpop.f32.mrb[0].mxu0 }
  0xf3   :  { %v143_v55 = vadd.f32 %v142_v53, %v70_v52  ;;  %v213_v56 = vpop.f32.mrb[0].mxu1  ;;  %v144_v57 = vpop.f32.mrb[1].mxu0 }
  0xf4   :  { %v214_v58 = vadd.f32 %v213_v56, %v70_v52  ;;  %v145_v59 = vadd.f32 %v144_v57, %v70_v52  ;;  %v215_v60 = vpop.f32.mrb[1].mxu1  ;;  %v582_v56 = vmov 2  }
  0xf5   :  { %vm361_vm1 = vcmp.ge.f32.partialorder %v143_v55, 0.0  ;;  %v370_v61 = vmul.f32 %v369_v54, %v143_v55  ;;  %v216_v62 = vadd.f32 %v215_v60, %v70_v52  ;;  %525 = vset.pattern.permute.xlu0 %v582_v56 }
  0xf6   :  { %v372_v63 = vmul.f32 %v369_v54, %v214_v58  ;;  %vm362_vm2 = vcmp.ge.f32.partialorder %v145_v59, 0.0  ;;  %v371_v0 = vmul.f32 %v369_v54, %v145_v59  ;;  %vm363_vm3 = vcmp.ge.f32.partialorder %v214_v58, 0.0 }
  0xf7   :  { %v378_v1 = vsel %vm361_vm1, %v143_v55, %v370_v61  ;;  %v373_v3 = vmul.f32 %v369_v54, %v216_v62  ;;  %vm364_vm4 = vcmp.ge.f32.partialorder %v216_v62, 0.0  ;;  %v581_v55 = vmov 1  }
  0xf8   :  { %v379_v2 = vsel %vm362_vm2, %v145_v59, %v371_v0  ;;  %v380_v5 = vsel %vm363_vm3, %v214_v58, %v372_v63  ;;  %523 = vset.pattern.permute.xlu1 %v581_v55 }
  0xf9   :  { %v386_v4 = vadd.f32 %v379_v2, %v378_v1  ;;  %v381_v11 = vsel %vm364_vm4, %v216_v62, %v373_v3 }
  0xfa   :  { %v284_v6 = vpop.f32.mrb[2].mxu0 }
  0xfb   :  { %v387_v7 = vadd.f32 %v386_v4, %v380_v5  ;;  %v285_v8 = vadd.f32 %v284_v6, %v70_v52  ;;  %v355_v9 = vpop.f32.mrb[2].mxu1  ;;  %v286_v10 = vpop.f32.mrb[3].mxu0 }
  0xfc   :  { %v356_v12 = vadd.f32 %v355_v9, %v70_v52  ;;  %v287_v13 = vadd.f32 %v286_v10, %v70_v52  ;;  %v357_v14 = vpop.f32.mrb[3].mxu1 }
  0xfd   :  { %v388_v15 = vadd.f32 %v387_v7, %v381_v11  ;;  %vm365_vm5 = vcmp.ge.f32.partialorder %v285_v8, 0.0  ;;  %v374_v16 = vmul.f32 %v369_v54, %v285_v8  ;;  %v358_v17 = vadd.f32 %v357_v14, %v70_v52 }
  0xfe   :  { %vm366_vm6 = vcmp.ge.f32.partialorder %v287_v13, 0.0  ;;  %v375_v18 = vmul.f32 %v369_v54, %v287_v13  ;;  %v376_v20 = vmul.f32 %v369_v54, %v356_v12  ;;  %vm367_vm7 = vcmp.ge.f32.partialorder %v356_v12, 0.0 }
  0xff   :  { %v382_v19 = vsel %vm365_vm5, %v285_v8, %v374_v16  ;;  %v377_v23 = vmul.f32 %v369_v54, %v358_v17  ;;  %vm368_vm8 = vcmp.ge.f32.partialorder %v358_v17, 0.0 }
 0x100   :  { %v389_v21 = vadd.f32 %v388_v15, %v382_v19  ;;  %v383_v22 = vsel %vm366_vm6, %v287_v13, %v375_v18  ;;  %v384_v25 = vsel %vm367_vm7, %v356_v12, %v376_v20 }
 0x101   :  { %v385_v27 = vsel %vm368_vm8, %v358_v17, %v377_v23 }
 0x102   :  { %v390_v24 = vadd.f32 %v389_v21, %v383_v22 }
 0x104   :  { %v391_v26 = vadd.f32 %v390_v24, %v384_v25 }
 0x106   :  { %v392_v28 = vadd.f32 %v391_v26, %v385_v27 }
 0x108   :  { %393 = vadd.xlane.f32.xlu0 %v392_v28 }
 0x195   :  { %v394_v29 = vpop.xlane.xlu0 %393 }
 0x196   :  { %v395_v30 = vmul.f32 0.0009765625, %v394_v29 }
 0x198   :  { %v396_v31 = vsub.f32 %v378_v1, %v395_v30  ;;  %v397_v32 = vsub.f32 %v379_v2, %v395_v30  ;;  %v398_v33 = vsub.f32 %v380_v5, %v395_v30  ;;  %v399_v34 = vsub.f32 %v381_v11, %v395_v30 }
 0x199   :  { %v400_v37 = vsub.f32 %v382_v19, %v395_v30  ;;  %v401_v40 = vsub.f32 %v383_v22, %v395_v30  ;;  %v402_v43 = vsub.f32 %v384_v25, %v395_v30  ;;  %v403_v46 = vsub.f32 %v385_v27, %v395_v30 }
 0x19a   :  { %v404_v35 = vmul.f32 %v396_v31, %v396_v31  ;;  %v405_v36 = vmul.f32 %v397_v32, %v397_v32  ;;  %v406_v38 = vmul.f32 %v398_v33, %v398_v33  ;;  %v407_v41 = vmul.f32 %v399_v34, %v399_v34 }
 0x19b   :  { %v408_v44 = vmul.f32 %v400_v37, %v400_v37  ;;  %v409_v47 = vmul.f32 %v401_v40, %v401_v40  ;;  %v410_v49 = vmul.f32 %v402_v43, %v402_v43  ;;  %v411_v52 = vmul.f32 %v403_v46, %v403_v46 }
 0x19c   :  { %v412_v39 = vadd.f32 %v405_v36, %v404_v35 }
 0x19e   :  { %v413_v42 = vadd.f32 %v412_v39, %v406_v38 }
 0x1a0   :  { %v414_v45 = vadd.f32 %v413_v42, %v407_v41 }
 0x1a2   :  { %v415_v48 = vadd.f32 %v414_v45, %v408_v44 }
 0x1a4   :  { %v416_v51 = vadd.f32 %v415_v48, %v409_v47 }
 0x1a6   :  { %v417_v53 = vadd.f32 %v416_v51, %v410_v49 }
 0x1a8   :  { %v418_v54 = vadd.f32 %v417_v53, %v411_v52 }
 0x1aa   :  { %419 = vadd.xlane.f32.xlu1 %v418_v54 }
 0x237   :  { %v420_v57 = vpop.xlane.xlu1 %419 }
 0x238   :  { %v421_v58 = vmul.f32 0.0009765625, %v420_v57 }
 0x23a   :  { %v422_v59 = vadd.f32 1e-05, %v421_v58 }
 0x23c   :  { %526 = vrsqrt.f32 %v422_v59 }
 0x246   :  { %v527_v60 = vpop.eup %526 }
 0x247   :  { %v424_v61 = vmul.f32 %v527_v60, %v633_v50 }
 0x249   :  { %427 = vperm.xlu1 %523, %v424_v61  }
 0x24d   :  { %524 = vset.pattern.permute.xlu1 %v582_v56 }
 0x24e   :  { %439 = vperm.xlu1 %524, %v633_v50  }
 0x2c8   :  { %v428_v62 = vpop.permute.xlu1 %427 }
 0x2c9   :  { %v430_v63 = vmul.f32 %v428_v62, %v396_v31  ;;  %v431_v0 = vmul.f32 %v428_v62, %v397_v32  ;;  %v432_v1 = vmul.f32 %v428_v62, %v398_v33  ;;  %v433_v2 = vmul.f32 %v428_v62, %v399_v34 }
 0x2ca   :  { %v434_v3 = vmul.f32 %v428_v62, %v400_v37  ;;  %v435_v4 = vmul.f32 %v428_v62, %v401_v40  ;;  %v436_v5 = vmul.f32 %v428_v62, %v402_v43  ;;  %v437_v6 = vmul.f32 %v428_v62, %v403_v46 }
 0x2cd   :  { %v440_v7 = vpop.permute.xlu1 %439 }
 0x2ce   :  { %v442_v8 = vadd.f32 %v440_v7, %v430_v63  ;;  %v443_v9 = vadd.f32 %v440_v7, %v431_v0  ;;  %v444_v10 = vadd.f32 %v440_v7, %v432_v1  ;;  %v445_v11 = vadd.f32 %v440_v7, %v433_v2 }
 0x2cf   :  { %v446_v50 = vadd.f32 %v440_v7, %v434_v3  ;;  %v447_v12 = vadd.f32 %v440_v7, %v435_v4  ;;  %v448_v13 = vadd.f32 %v440_v7, %v436_v5  ;;  %v449_v14 = vadd.f32 %v440_v7, %v437_v6 }
 0x2d0   :  { %450 = vst [vmem:[#allocation6] sm:$0xff] %v442_v8  ;;  %451 = vst [vmem:[#allocation6 + $0x8] sm:$0xff] %v443_v9 }
 0x2d1   :  { %452 = vst [vmem:[#allocation6 + $0x10] sm:$0xff] %v444_v10  ;;  %453 = vst [vmem:[#allocation6 + $0x18] sm:$0xff] %v445_v11 }
 0x2d2   :  { %455 = vst [vmem:[#allocation6 + $0x20] sm:$0xff] %v446_v50  ;;  %456 = vst [vmem:[#allocation6 + $0x28] sm:$0xff] %v447_v12 }
 0x2d3   :  { %457 = vst [vmem:[#allocation6 + $0x30] sm:$0xff] %v448_v13  ;;  %458 = vst [vmem:[#allocation6 + $0x38] sm:$0xff] %v449_v14 }
 0x2d4   :  { %561 = shalt.err (!%p558_p12)
}
 0x2d5   :  { %s562_s10 = scalar_lea.hbm %s668_s4, 1024 }
 0x2d6   :  { %p563_p13 = scmp.ne.s32.totalorder %s668_s4, %s562_s10  ;;  %p566_p0 = scmp.lt.u32.totalorder %s562_s10, %s668_s4 }
 0x2d8   :  { %p568_p1 = pnand %p566_p0, %p563_p13 }
 0x2da   :  { %571 = shalt.err (!%p568_p1)
}
 0x2db   :  { %s584_s15 = smov 512   ;;  %s585_s16 = smov 32  }
 0x2dc   :  { %470 = dma.vmem_to_hbm [thread:$0]  %s645_s6, 1024, %s668_s4, [#allocation5], %s584_s15, %s584_s15, %s585_s16  }
 0x2dd   :  { %574 = dma.done.wait [#allocation5], 1024  }
 0x2de   :  { %575 = vsyncadd [#allocation5], 4294966272 }
 0x2df   :  { %474 = vsyncpa [#allocation4], 1 }
 0x2e0   :  { %475 = vsyncpa [#allocation5], 1 }

</bundles_post_ra>
